<compile_context>
chip_gen: v6e
topology: v6e:2x2x1
jax: 0.10.0
libtpu: 0.0.40
codegen_flags: <defaults>
</compile_context>

<pallas_src>
import functools
import math

import jax
import jax.numpy as jnp
from jax.experimental import pallas as pl
from jax.experimental.pallas import tpu as pltpu

RRELU_SLOPE = (1.0 / 8.0 + 1.0 / 3.0) / 2.0  # 11/48, torch.rrelu eval-mode slope
LANE = 128
SUBLANE = 8


def _cdiv(a, b):
    return -(-a // b)


def _round_up(x, m):
    return _cdiv(x, m) * m


def _rrelu(x):
    # Deterministic rrelu (training=False): x if x >= 0 else slope * x.
    # TODO(synk): training-mode torch.rrelu samples the slope per element; not modeled.
    return jnp.where(x >= 0, x, RRELU_SLOPE * x)


def _q_network_kernel(x_ref, w1_ref, b1_ref, w2_ref, b2_ref, w3_ref, b3_ref, o_ref):
    # Batch-on-lanes layout:
    #   x_ref: (S, TB) f32, w*: (out, in) bf16, b*: (out, 1) f32, o_ref: (A_pad, TB) f32.
    x = x_ref[...].astype(jnp.bfloat16)                                 # cast in-kernel (VPU)
    h1 = jnp.dot(w1_ref[...], x, preferred_element_type=jnp.float32)   # (H, TB)
    h1 = _rrelu(h1 + b1_ref[...]).astype(jnp.bfloat16)
    h2 = jnp.dot(w2_ref[...], h1, preferred_element_type=jnp.float32)  # (H, TB)
    h2 = _rrelu(h2 + b2_ref[...]).astype(jnp.bfloat16)
    h3 = jnp.dot(w3_ref[...], h2, preferred_element_type=jnp.float32)  # (A_pad, TB)
    o_ref[...] = (h3 + b3_ref[...]).astype(o_ref.dtype)


def prepare_params(params):
    """One-time conversion of PyTorch-layout params to kernel layout.

    Input:  w* of shape (out, in) f32, b* of shape (out,) f32 (nn.Linear layout).
    Output: w* bf16 (out, in), b* f32 (out, 1); fc3 padded to 8 output rows.
    """
    A = params["w3"].shape[0]
    A_pad = _round_up(A, SUBLANE)

    def wb(w, b, pad_out=None):
        w = w.astype(jnp.bfloat16)
        b = b.astype(jnp.float32).reshape(-1, 1)
        if pad_out is not None and pad_out != w.shape[0]:
            w = jnp.pad(w, ((0, pad_out - w.shape[0]), (0, 0)))
            b = jnp.pad(b, ((0, pad_out - b.shape[0]), (0, 0)))
        return w, b

    w1, b1 = wb(params["w1"], params["b1"])
    w2, b2 = wb(params["w2"], params["b2"])
    w3, b3 = wb(params["w3"], params["b3"], pad_out=A_pad)
    return {"w1": w1, "b1": b1, "w2": w2, "b2": b2, "w3": w3, "b3": b3}


@functools.partial(jax.jit, static_argnames=("action_size", "max_tb"))
def q_network_forward(x, kparams, action_size, max_tb=2048):
    """x: (B, state_size) f32; kparams: output of prepare_params(). Returns (B, action_size) f32."""
    B, S = x.shape
    H = kparams["w1"].shape[0]
    A_pad = kparams["w3"].shape[0]

    # Batch tiling: batch lives on the 128-lane axis.  Pad B to a multiple of 128,
    # split into near-equal lane-multiple tiles, and keep >=2 grid steps when the
    # batch is big enough so v7x megacore can shard the "parallel" axis.
    B_lane = _round_up(max(B, 1), LANE)
    n_tiles = max(1, _cdiv(B_lane, max_tb))
    if n_tiles == 1 and B_lane >= 2 * LANE:
        n_tiles = 2
    TB = _round_up(_cdiv(B_lane, n_tiles), LANE)
    B_pad = TB * n_tiles

    # (S, B_pad) f32 — the bf16 cast happens inside the kernel.
    x_t = jnp.pad(x.T, ((0, 0), (0, B_pad - B)))

    def resident(shape):
        # Same block at every grid step -> fetched once, stays VMEM-resident.
        return pl.BlockSpec(shape, lambda i: (0, 0))

    flops = 2 * B_pad * (S * H + H * H + H * A_pad)
    bytes_accessed = (
        x_t.size * 4
        + (kparams["w1"].size + kparams["w2"].size + kparams["w3"].size) * 2
        + (kparams["b1"].size + kparams["b2"].size + kparams["b3"].size) * 4
        + B_pad * A_pad * 4
    )

    out = pl.pallas_call(
        _q_network_kernel,
        out_shape=jax.ShapeDtypeStruct((A_pad, B_pad), jnp.float32),
        grid_spec=pltpu.PrefetchScalarGridSpec(
            num_scalar_prefetch=0,
            grid=(n_tiles,),
            in_specs=[
                pl.BlockSpec((S, TB), lambda i: (0, i)),   # x: tiled over batch (lanes)
                resident((H, S)),                          # w1 (128, S)
                resident((H, 1)),                          # b1
                resident((H, H)),                          # w2
                resident((H, 1)),                          # b2
                resident((A_pad, H)),                      # w3 (8, 128)
                resident((A_pad, 1)),                      # b3
            ],
            out_specs=pl.BlockSpec((A_pad, TB), lambda i: (0, i)),
        ),
        compiler_params=pltpu.CompilerParams(
            dimension_semantics=("parallel",),             # megacore on v7x
        ),
        cost_estimate=pl.CostEstimate(
            flops=flops, transcendentals=0, bytes_accessed=bytes_accessed
        ),
    )(x_t, kparams["w1"], kparams["b1"], kparams["w2"], kparams["b2"],
      kparams["w3"], kparams["b3"])

    # (A_pad, B_pad) -> (B, A): tiny (16 B / batch row) slice + transpose.
    return out[:action_size, :B].T


def init_params(key, state_size, action_size, hidden=128):
    """Deterministic synthetic parameters in PyTorch nn.Linear layout: w (out, in), b (out,)."""
    ks = jax.random.split(key, 6)

    def linear(kw, kb, fan_in, fan_out):
        bound = 1.0 / math.sqrt(fan_in)
        w = jax.random.uniform(kw, (fan_out, fan_in), jnp.float32, -bound, bound)
        b = jax.random.uniform(kb, (fan_out,), jnp.float32, -bound, bound)
        return w, b

    w1, b1 = linear(ks[0], ks[1], state_size, hidden)
    w2, b2 = linear(ks[2], ks[3], hidden, hidden)
    w3, b3 = linear(ks[4], ks[5], hidden, action_size)
    return {"w1": w1, "b1": b1, "w2": w2, "b2": b2, "w3": w3, "b3": b3}


def q_network_ref(x, params):
    """Pure-JAX reference mirroring the kernel's bf16 matmul / f32 accumulate math."""
    def layer(h, w, b):
        return jnp.dot(h.astype(jnp.bfloat16), w.T.astype(jnp.bfloat16),
                       preferred_element_type=jnp.float32) + b

    h = _rrelu(layer(x, params["w1"], params["b1"]))
    h = _rrelu(layer(h, params["w2"], params["b2"]))
    return layer(h, params["w3"], params["b3"])


if __name__ == "__main__":
    key = jax.random.PRNGKey(0)
    k_x1, k_x2, k_p = jax.random.split(key, 3)

    state_size, action_size = 16, 4
    params = init_params(k_p, state_size, action_size)
    kparams = jax.block_until_ready(prepare_params(params))   # one-time prep

    # Case 1: small batch (single grid step, heavy lane padding but trivial work).
    x1 = jax.random.normal(k_x1, (8, state_size), jnp.float32)
    out1 = jax.block_until_ready(q_network_forward(x1, kparams, action_size))
    ref1 = q_network_ref(x1, params)
    assert out1.shape == (8, action_size)
    assert jnp.allclose(out1, ref1, atol=2e-3, rtol=2e-3)

    # Case 2: batch not a multiple of 128 (exercises padding + 2-step grid).
    x2 = jax.random.normal(k_x2, (300, state_size), jnp.float32)
    out2 = jax.block_until_ready(q_network_forward(x2, kparams, action_size))
    ref2 = q_network_ref(x2, params)
    assert out2.shape == (300, action_size)
    assert jnp.allclose(out2, ref2, atol=2e-3, rtol=2e-3)

    print("KERNEL_OK")
</pallas_src>

<mosaic_0001>
module attributes {stable_mosaic.version = 11 : i64} {
  func.func @_q_network_kernel(%arg0: i32, %arg1: memref<16x128xf32, #tpu.memory_space<vmem>>, %arg2: memref<128x16xbf16, #tpu.memory_space<vmem>>, %arg3: memref<128x1xf32, #tpu.memory_space<vmem>>, %arg4: memref<128x128xbf16, #tpu.memory_space<vmem>>, %arg5: memref<128x1xf32, #tpu.memory_space<vmem>>, %arg6: memref<8x128xbf16, #tpu.memory_space<vmem>>, %arg7: memref<8x1xf32, #tpu.memory_space<vmem>>, %arg8: memref<8x128xf32, #tpu.memory_space<vmem>>) attributes {dimension_semantics = [#tpu.dimension_semantics<parallel>], iteration_bounds = array<i64: 1>, scalar_prefetch = 0 : i64, scratch_operands = 0 : i64, tpu.core_type = #tpu.core_type<tc>, window_params = [{transform_indices = @transform_0, window_bounds = array<i64: 16, 128>}, {pipeline_mode = #tpu.pipeline_mode<synchronous>, transform_indices = @transform_1, window_bounds = array<i64: 128, 16>}, {pipeline_mode = #tpu.pipeline_mode<synchronous>, transform_indices = @transform_2, window_bounds = array<i64: 128, 1>}, {pipeline_mode = #tpu.pipeline_mode<synchronous>, transform_indices = @transform_3, window_bounds = array<i64: 128, 128>}, {pipeline_mode = #tpu.pipeline_mode<synchronous>, transform_indices = @transform_4, window_bounds = array<i64: 128, 1>}, {pipeline_mode = #tpu.pipeline_mode<synchronous>, transform_indices = @transform_5, window_bounds = array<i64: 8, 128>}, {pipeline_mode = #tpu.pipeline_mode<synchronous>, transform_indices = @transform_6, window_bounds = array<i64: 8, 1>}, {transform_indices = @transform_7, window_bounds = array<i64: 8, 128>}]} {
    %c0 = arith.constant 0 : index
    %c0_0 = arith.constant 0 : index
    %0 = vector.load %arg1[%c0, %c0_0] : memref<16x128xf32, #tpu.memory_space<vmem>>, vector<16x128xf32>
    %1 = arith.truncf %0 : vector<16x128xf32> to vector<16x128xbf16>
    %c0_1 = arith.constant 0 : index
    %c0_2 = arith.constant 0 : index
    %2 = vector.load %arg2[%c0_1, %c0_2] : memref<128x16xbf16, #tpu.memory_space<vmem>>, vector<128x16xbf16>
    %cst = arith.constant dense<0.000000e+00> : vector<128x128xf32>
    %3 = tpu.matmul %2, %1, %cst {dimension_numbers = #tpu.dot_dimension_numbers<[1], [0], [0], [1], [0, 0, 1, 1], [], []>} : vector<128x16xbf16>, vector<16x128xbf16>, vector<128x128xf32> -> vector<128x128xf32>
    %c0_3 = arith.constant 0 : index
    %c0_4 = arith.constant 0 : index
    %4 = vector.load %arg3[%c0_3, %c0_4] : memref<128x1xf32, #tpu.memory_space<vmem>>, vector<128x1xf32>
    %5 = vector.broadcast %4 : vector<128x1xf32> to vector<128x128xf32>
    %6 = arith.addf %3, %5 : vector<128x128xf32>
    %cst_5 = arith.constant 0.000000e+00 : f32
    %7 = vector.broadcast %cst_5 : f32 to vector<128x128xf32>
    %8 = arith.cmpf oge, %6, %7 : vector<128x128xf32>
    %cst_6 = arith.constant 0.229166672 : f32
    %9 = vector.broadcast %cst_6 : f32 to vector<128x128xf32>
    %10 = arith.mulf %9, %6 : vector<128x128xf32>
    %11 = arith.select %8, %6, %10 : vector<128x128xi1>, vector<128x128xf32>
    %12 = arith.truncf %11 : vector<128x128xf32> to vector<128x128xbf16>
    %c0_7 = arith.constant 0 : index
    %c0_8 = arith.constant 0 : index
    %13 = vector.load %arg4[%c0_7, %c0_8] : memref<128x128xbf16, #tpu.memory_space<vmem>>, vector<128x128xbf16>
    %cst_9 = arith.constant dense<0.000000e+00> : vector<128x128xf32>
    %14 = tpu.matmul %13, %12, %cst_9 {dimension_numbers = #tpu.dot_dimension_numbers<[1], [0], [0], [1], [0, 0, 1, 1], [], []>} : vector<128x128xbf16>, vector<128x128xbf16>, vector<128x128xf32> -> vector<128x128xf32>
    %c0_10 = arith.constant 0 : index
    %c0_11 = arith.constant 0 : index
    %15 = vector.load %arg5[%c0_10, %c0_11] : memref<128x1xf32, #tpu.memory_space<vmem>>, vector<128x1xf32>
    %16 = vector.broadcast %15 : vector<128x1xf32> to vector<128x128xf32>
    %17 = arith.addf %14, %16 : vector<128x128xf32>
    %cst_12 = arith.constant 0.000000e+00 : f32
    %18 = vector.broadcast %cst_12 : f32 to vector<128x128xf32>
    %19 = arith.cmpf oge, %17, %18 : vector<128x128xf32>
    %cst_13 = arith.constant 0.229166672 : f32
    %20 = vector.broadcast %cst_13 : f32 to vector<128x128xf32>
    %21 = arith.mulf %20, %17 : vector<128x128xf32>
    %22 = arith.select %19, %17, %21 : vector<128x128xi1>, vector<128x128xf32>
    %23 = arith.truncf %22 : vector<128x128xf32> to vector<128x128xbf16>
    %c0_14 = arith.constant 0 : index
    %c0_15 = arith.constant 0 : index
    %24 = vector.load %arg6[%c0_14, %c0_15] : memref<8x128xbf16, #tpu.memory_space<vmem>>, vector<8x128xbf16>
    %cst_16 = arith.constant dense<0.000000e+00> : vector<8x128xf32>
    %25 = tpu.matmul %24, %23, %cst_16 {dimension_numbers = #tpu.dot_dimension_numbers<[1], [0], [0], [1], [0, 0, 1, 1], [], []>} : vector<8x128xbf16>, vector<128x128xbf16>, vector<8x128xf32> -> vector<8x128xf32>
    %c0_17 = arith.constant 0 : index
    %c0_18 = arith.constant 0 : index
    %26 = vector.load %arg7[%c0_17, %c0_18] : memref<8x1xf32, #tpu.memory_space<vmem>>, vector<8x1xf32>
    %27 = vector.broadcast %26 : vector<8x1xf32> to vector<8x128xf32>
    %28 = arith.addf %25, %27 : vector<8x128xf32>
    %c0_19 = arith.constant 0 : index
    %c0_20 = arith.constant 0 : index
    %29 = vector.load %arg8[%c0_19, %c0_20] : memref<8x128xf32, #tpu.memory_space<vmem>>, vector<8x128xf32>
    tpu.vector_store %arg8[%c0_19, %c0_20], %28 {strides = array<i32>} : memref<8x128xf32, #tpu.memory_space<vmem>>, vector<8x128xf32>,
    return
  }
  func.func @transform_0(%arg0: i32) -> (i32, i32) {
    %c0_i32 = arith.constant 0 : i32
    %c0_i32_0 = arith.constant 0 : i32
    return %c0_i32, %arg0 : i32, i32
  }
  func.func @transform_1(%arg0: i32) -> (i32, i32) {
    %c0_i32 = arith.constant 0 : i32
    %c0_i32_0 = arith.constant 0 : i32
    %c0_i32_1 = arith.constant 0 : i32
    return %c0_i32, %c0_i32_0 : i32, i32
  }
  func.func @transform_2(%arg0: i32) -> (i32, i32) {
    %c0_i32 = arith.constant 0 : i32
    %c0_i32_0 = arith.constant 0 : i32
    %c0_i32_1 = arith.constant 0 : i32
    return %c0_i32, %c0_i32_0 : i32, i32
  }
  func.func @transform_3(%arg0: i32) -> (i32, i32) {
    %c0_i32 = arith.constant 0 : i32
    %c0_i32_0 = arith.constant 0 : i32
    %c0_i32_1 = arith.constant 0 : i32
    return %c0_i32, %c0_i32_0 : i32, i32
  }
  func.func @transform_4(%arg0: i32) -> (i32, i32) {
    %c0_i32 = arith.constant 0 : i32
    %c0_i32_0 = arith.constant 0 : i32
    %c0_i32_1 = arith.constant 0 : i32
    return %c0_i32, %c0_i32_0 : i32, i32
  }
  func.func @transform_5(%arg0: i32) -> (i32, i32) {
    %c0_i32 = arith.constant 0 : i32
    %c0_i32_0 = arith.constant 0 : i32
    %c0_i32_1 = arith.constant 0 : i32
    return %c0_i32, %c0_i32_0 : i32, i32
  }
  func.func @transform_6(%arg0: i32) -> (i32, i32) {
    %c0_i32 = arith.constant 0 : i32
    %c0_i32_0 = arith.constant 0 : i32
    %c0_i32_1 = arith.constant 0 : i32
    return %c0_i32, %c0_i32_0 : i32, i32
  }
  func.func @transform_7(%arg0: i32) -> (i32, i32) {
    %c0_i32 = arith.constant 0 : i32
    %c0_i32_0 = arith.constant 0 : i32
    return %c0_i32, %arg0 : i32, i32
  }
}

</mosaic_0001>

<bundles_post_ra>
// kernel: q_network_forward.1
= control target key start
LH: loop header
LB: loop body
LE: loop exit
PB: predicated region body
PF: predicated region fallthrough
CT: control target
= control target key end

     0   :  { %vm182_vm0 = vcmask 130048   ;;  %v874_v2 = vmov 0   ;;  %s1123_s0 = inlined_call_operand.vmem [shape: f32[16,128], index: 0, kind: input, shape index: {}]   ;;  %s1124_s1 = inlined_call_operand.vmem [shape: bf16[128,16], index: 1, kind: input, shape index: {}]   ;;  %s1125_s2 = inlined_call_operand.vmem [shape: f32[128,1], index: 2, kind: input, shape index: {}]   ;;  %s1126_s4 = inlined_call_operand.vmem [shape: f32[128,1], index: 4, kind: input, shape index: {}]   ;;  %s1127_s6 = inlined_call_operand.vmem [shape: f32[8,1], index: 6, kind: input, shape index: {}]   ;;  %s1128_s3 = inlined_call_operand.vmem [shape: bf16[128,128], index: 3, kind: input, shape index: {}]   ;;  %s1129_s5 = inlined_call_operand.vmem [shape: bf16[8,128], index: 5, kind: input, shape index: {}]   ;;  %s1130_s7 = inlined_call_operand.vmem [shape: f32[8,128], index: 7, kind: output, shape index: {}]  }
   0x1   :  { %v27_v0 = vld [vmem:[%s1123_s0] sm:$0xff]  ;;  %v28_v1 = vld [vmem:[%s1123_s0 + $0x8] sm:$0xff]  ;;  %856 = vset.pattern.permute.xlu0 %v874_v2  ;;  %857 = vset.pattern.permute.xlu1 %v874_v2  ;;  %v860_v6 = vld [vmem:[%s1124_s1 + $0x10] sm:$0xff]  }
   0x2   :  { %v29_v3 = vpack.c.bf16 %v28_v1, %v27_v0  ;;  %v858_v4 = vld [vmem:[%s1124_s1] sm:$0xff]   ;;  %v859_v5 = vld [vmem:[%s1124_s1 + $0x8] sm:$0xff]   ;;  %v60_v7 = vld [vmem:[%s1125_s2 + $0x70] sm:$0xff] }
   0x3   :  { %785 = vmatprep.mubr.msk.bf16.mxu0 %vm182_vm0, %v858_v4  ;;  %134 = vperm.xlu0 %856, %v60_v7   ;;  %v58_v8 = vld [vmem:[%s1125_s2 + $0x60] sm:$0xff]  ;;  %v61_v9 = vld [vmem:[%s1125_s2 + $0x78] sm:$0xff]  ;;  %v59_v11 = vld [vmem:[%s1125_s2 + $0x68] sm:$0xff] }
   0x4   :  { %783 = vmatprep.subr.bf16.mxu0 %v29_v3  ;;  %124 = vperm.xlu1 %857, %v58_v8   ;;  %v861_v10 = vld [vmem:[%s1124_s1 + $0x18] sm:$0xff]   ;;  %v862_v12 = vld [vmem:[%s1124_s1 + $0x20] sm:$0xff]   ;;  %v56_v13 = vld [vmem:[%s1125_s2 + $0x50] sm:$0xff] }
   0x5   :  { %784 = vmatpush3.bf16.msra.mxu0 %v29_v3  ;;  %v57_v14 = vld [vmem:[%s1125_s2 + $0x58] sm:$0xff]  ;;  %v54_v15 = vld [vmem:[%s1125_s2 + $0x40] sm:$0xff]  ;;  %v863_v16 = vld [vmem:[%s1124_s1 + $0x28] sm:$0xff]  }
   0x6   :  { %v55_v17 = vld [vmem:[%s1125_s2 + $0x48] sm:$0xff]  ;;  %v864_v18 = vld [vmem:[%s1124_s1 + $0x30] sm:$0xff]   ;;  %v53_v20 = vld [vmem:[%s1125_s2 + $0x38] sm:$0xff] }
   0x7   :  { %139 = vperm.xlu0 %856, %v61_v9   ;;  %v52_v19 = vld [vmem:[%s1125_s2 + $0x30] sm:$0xff]  ;;  %v50_v21 = vld [vmem:[%s1125_s2 + $0x20] sm:$0xff]  ;;  %v865_v22 = vld [vmem:[%s1124_s1 + $0x38] sm:$0xff]  }
   0x8   :  { %786 = vmatmul.mubr.msk.bf16.vlgmr.msra.gmra.mxu0 %vm182_vm0, %v859_v5  ;;  %129 = vperm.xlu1 %857, %v59_v11   ;;  %v51_v23 = vld [vmem:[%s1125_s2 + $0x28] sm:$0xff]  ;;  %v48_v24 = vld [vmem:[%s1125_s2 + $0x10] sm:$0xff]  ;;  %v49_v25 = vld [vmem:[%s1125_s2 + $0x18] sm:$0xff] }
   0x9   :  { %789 = vmatprep.mubr.msk.bf16.mxu0 %vm182_vm0, %v860_v6  ;;  %v46_v26 = vld [vmem:[%s1125_s2] sm:$0xff]  ;;  %v47_v27 = vld [vmem:[%s1125_s2 + $0x8] sm:$0xff]  ;;  %v390_v28 = vld [vmem:[%s1126_s4 + $0x70] sm:$0xff] }
   0xa   :  { %v391_v29 = vld [vmem:[%s1126_s4 + $0x78] sm:$0xff]  ;;  %v388_v30 = vld [vmem:[%s1126_s4 + $0x60] sm:$0xff]  ;;  %v389_v31 = vld [vmem:[%s1126_s4 + $0x68] sm:$0xff] }
   0xb   :  { %114 = vperm.xlu0 %856, %v56_v13   ;;  %v386_v32 = vld [vmem:[%s1126_s4 + $0x50] sm:$0xff]  ;;  %v387_v33 = vld [vmem:[%s1126_s4 + $0x58] sm:$0xff]  ;;  %v384_v34 = vld [vmem:[%s1126_s4 + $0x40] sm:$0xff] }
   0xc   :  { %119 = vperm.xlu1 %857, %v57_v14   ;;  %v385_v35 = vld [vmem:[%s1126_s4 + $0x48] sm:$0xff]  ;;  %v382_v36 = vld [vmem:[%s1126_s4 + $0x30] sm:$0xff]  ;;  %v383_v37 = vld [vmem:[%s1126_s4 + $0x38] sm:$0xff] }
   0xd   :  { %v380_v38 = vld [vmem:[%s1126_s4 + $0x20] sm:$0xff]  ;;  %v381_v39 = vld [vmem:[%s1126_s4 + $0x28] sm:$0xff]  ;;  %v378_v40 = vld [vmem:[%s1126_s4 + $0x10] sm:$0xff] }
   0xe   :  { %v379_v41 = vld [vmem:[%s1126_s4 + $0x18] sm:$0xff]  ;;  %v376_v42 = vld [vmem:[%s1126_s4] sm:$0xff]  ;;  %v377_v43 = vld [vmem:[%s1126_s4 + $0x8] sm:$0xff] }
   0xf   :  { %104 = vperm.xlu0 %856, %v54_v15   ;;  %v674_v44 = vld [vmem:[%s1127_s6] sm:$0xff] }
  0x10   :  { %790 = vmatmul.mubr.msk.bf16.gmra.mxu0 %vm182_vm0, %v861_v10  ;;  %109 = vperm.xlu1 %857, %v55_v17   ;;  %v866_v45 = vld [vmem:[%s1128_s3] sm:$0xff]  }
  0x11   :  { %793 = vmatprep.mubr.msk.bf16.mxu0 %vm182_vm0, %v862_v12  ;;  %817 = vmatprep.mubr.bf16.mxu1 %v866_v45 }
  0x13   :  { %94 = vperm.xlu0 %856, %v52_v19  }
  0x14   :  { %99 = vperm.xlu1 %857, %v53_v20  }
  0x17   :  { %84 = vperm.xlu0 %856, %v50_v21  }
  0x18   :  { %794 = vmatmul.mubr.msk.bf16.gmra.mxu0 %vm182_vm0, %v863_v16  ;;  %89 = vperm.xlu1 %857, %v51_v23  }
  0x19   :  { %797 = vmatprep.mubr.msk.bf16.mxu0 %vm182_vm0, %v864_v18 }
  0x1b   :  { %74 = vperm.xlu0 %856, %v48_v24  }
  0x1c   :  { %79 = vperm.xlu1 %857, %v49_v25  }
  0x1f   :  { %64 = vperm.xlu0 %856, %v46_v26  }
  0x20   :  { %798 = vmatmul.mubr.msk.bf16.gmra.mxu0 %vm182_vm0, %v865_v22  ;;  %69 = vperm.xlu1 %857, %v47_v27  }
  0x23   :  { %464 = vperm.xlu0 %856, %v390_v28  }
  0x24   :  { %469 = vperm.xlu1 %857, %v391_v29  }
  0x27   :  { %454 = vperm.xlu0 %856, %v388_v30  }
  0x28   :  { %459 = vperm.xlu1 %857, %v389_v31  }
  0x2b   :  { %444 = vperm.xlu0 %856, %v386_v32  }
  0x2c   :  { %449 = vperm.xlu1 %857, %v387_v33  }
  0x2f   :  { %434 = vperm.xlu0 %856, %v384_v34  }
  0x30   :  { %439 = vperm.xlu1 %857, %v385_v35  }
  0x33   :  { %424 = vperm.xlu0 %856, %v382_v36  }
  0x34   :  { %429 = vperm.xlu1 %857, %v383_v37  }
  0x37   :  { %414 = vperm.xlu0 %856, %v380_v38  }
  0x38   :  { %419 = vperm.xlu1 %857, %v381_v39  }
  0x3b   :  { %404 = vperm.xlu0 %856, %v378_v40  }
  0x3c   :  { %409 = vperm.xlu1 %857, %v379_v41  }
  0x3f   :  { %394 = vperm.xlu0 %856, %v376_v42  }
  0x40   :  { %399 = vperm.xlu1 %857, %v377_v43  }
  0x43   :  { %677 = vperm.xlu0 %856, %v674_v44  }
  0x7e   :  { %v135_v51 = vpop.permute.xlu0 %134 }
  0x7f   :  { %v125_v49 = vpop.permute.xlu1 %124 }
  0x82   :  { %v140_v56 = vpop.permute.xlu0 %139 }
  0x83   :  { %v130_v54 = vpop.permute.xlu1 %129 }
  0x86   :  { %v115_v61 = vpop.permute.xlu0 %114 }
  0x87   :  { %v120_v59 = vpop.permute.xlu1 %119 }
  0x8a   :  { %v105_v3 = vpop.permute.xlu0 %104 }
  0x8b   :  { %v110_v0 = vpop.permute.xlu1 %109 }
  0x8e   :  { %v95_v16 = vpop.permute.xlu0 %94 }
  0x8f   :  { %v100_v10 = vpop.permute.xlu1 %99 }
  0x92   :  { %v85_v32 = vpop.permute.xlu0 %84 }
  0x93   :  { %v90_v27 = vpop.permute.xlu1 %89 }
  0x96   :  { %v75_v44 = vpop.permute.xlu0 %74 }
  0x97   :  { %v80_v40 = vpop.permute.xlu1 %79 }
  0xc8   :  { %v1057_v46 = vpop.f32.mrf.mxu0 }
  0xca   :  { %v1059_v47 = vpop.f32.mrf.mxu0 }
  0xcc   :  { %v1061_v48 = vpop.f32.mrf.mxu0 }
  0xce   :  { %v1063_v50 = vpop.f32.mrf.mxu0 }
  0xd0   :  { %v791_v52 = vpop.f32.mrf.mxu0 }
  0xd1   :  { %v266_v33 = vadd.f32 %v791_v52, %v95_v16 }
  0xd2   :  { %v1065_v53 = vpop.f32.mrf.mxu0 }
  0xd3   :  { %v326_v41 = vmul.f32 0.22916667, %v266_v33  ;;  %v258_v42 = vadd.f32 %v1065_v53, %v85_v32  ;;  %vm310_vm10 = vcmp.ge.f32.partialorder %v266_v33, 0.0 }
  0xd4   :  { %v792_v55 = vpop.f32.mrf.mxu0 }
  0xd5   :  { %v269_v29 = vadd.f32 %v792_v55, %v100_v10  ;;  %v324_v55 = vmul.f32 0.22916667, %v258_v42  ;;  %vm308_vm12 = vcmp.ge.f32.partialorder %v258_v42, 0.0  ;;  %v871_v10 = vld [vmem:[%s1128_s3 + $0x28] sm:$0xff]  }
  0xd6   :  { %v260_v57 = vpop.f32.mrf.mxu0 }
  0xd7   :  { %v327_v37 = vmul.f32 0.22916667, %v269_v29  ;;  %v261_v38 = vadd.f32 %v260_v57, %v90_v27  ;;  %vm311_vm9 = vcmp.ge.f32.partialorder %v269_v29, 0.0  ;;  %v70_v57 = vpop.permute.xlu1 %69 }
  0xd8   :  { %v795_v58 = vpop.f32.mrf.mxu0  ;;  %v245_v53 = vadd.f32 %v1063_v50, %v70_v57 }
  0xd9   :  { %v282_v11 = vadd.f32 %v795_v58, %v115_v61  ;;  %v343_v52 = vsel %vm311_vm9, %v269_v29, %v327_v37  ;;  %vm309_vm11 = vcmp.ge.f32.partialorder %v261_v38, 0.0  ;;  %v65_v61 = vpop.permute.xlu0 %64 }
  0xda   :  { %v273_v60 = vpop.f32.mrf.mxu0  ;;  %vm305_vm15 = vcmp.ge.f32.partialorder %v245_v53, 0.0 }
  0xdb   :  { %v330_v23 = vmul.f32 0.22916667, %v282_v11  ;;  %v274_v24 = vadd.f32 %v273_v60, %v105_v3  ;;  %vm314_vm6 = vcmp.ge.f32.partialorder %v282_v11, 0.0 }
  0xdc   :  { %v796_v62 = vpop.f32.mrf.mxu0 }
  0xdd   :  { %v285_v6 = vadd.f32 %v796_v62, %v120_v59  ;;  %v328_v34 = vmul.f32 0.22916667, %v274_v24  ;;  %v346_v35 = vsel %vm314_vm6, %v282_v11, %v330_v23  ;;  %vm312_vm8 = vcmp.ge.f32.partialorder %v274_v24, 0.0  ;;  %v872_v11 = vld [vmem:[%s1128_s3 + $0x30] sm:$0xff]  }
  0xde   :  { %v276_v63 = vpop.f32.mrf.mxu0  ;;  %v242_v62 = vadd.f32 %v1059_v47, %v65_v61  ;;  %v867_v47 = vld [vmem:[%s1128_s3 + $0x8] sm:$0xff]  }
  0xdf   :  { %v331_v17 = vmul.f32 0.22916667, %v285_v6  ;;  %v277_v18 = vadd.f32 %v276_v63, %v110_v0  ;;  %vm315_vm5 = vcmp.ge.f32.partialorder %v285_v6, 0.0  ;;  %v344_v43 = vsel %vm312_vm8, %v274_v24, %v328_v34 }
  0xe0   :  { %v799_v1 = vpop.f32.mrf.mxu0  ;;  %v340_v63 = vsel %vm308_vm12, %v258_v42, %v324_v55  ;;  %vm304_vm0 = vcmp.ge.f32.partialorder %v242_v62, 0.0 }
  0xe1   :  { %v298_v2 = vadd.f32 %v799_v1, %v135_v51  ;;  %v329_v30 = vmul.f32 0.22916667, %v277_v18  ;;  %v347_v31 = vsel %vm315_vm5, %v285_v6, %v331_v17  ;;  %vm313_vm7 = vcmp.ge.f32.partialorder %v277_v18, 0.0 }
  0xe2   :  { %v289_v4 = vpop.f32.mrf.mxu0  ;;  %v357_v36 = vpack.c.bf16 %v347_v31, %v346_v35  ;;  %v325_v51 = vmul.f32 0.22916667, %v261_v38 }
  0xe3   :  { %v290_v5 = vadd.f32 %v289_v4, %v125_v49  ;;  %v334_v8 = vmul.f32 0.22916667, %v298_v2  ;;  %vm318_vm1 = vcmp.ge.f32.partialorder %v298_v2, 0.0  ;;  %v345_v39 = vsel %vm313_vm7, %v277_v18, %v329_v30  ;;  %v470_v18 = vpop.permute.xlu1 %469 }
  0xe4   :  { %v800_v7 = vpop.f32.mrf.mxu0  ;;  %v356_v45 = vpack.c.bf16 %v345_v39, %v344_v43  ;;  %v253_v49 = vadd.f32 %v1061_v48, %v80_v40  ;;  %v341_v60 = vsel %vm309_vm11, %v261_v38, %v325_v51 }
  0xe5   :  { %v301_v9 = vadd.f32 %v800_v7, %v140_v56  ;;  %v332_v13 = vmul.f32 0.22916667, %v290_v5  ;;  %vm316_vm3 = vcmp.ge.f32.partialorder %v290_v5, 0.0  ;;  %v350_v20 = vsel %vm318_vm1, %v298_v2, %v334_v8  ;;  %v868_v7 = vld [vmem:[%s1128_s3 + $0x10] sm:$0xff]   ;;  %v869_v8 = vld [vmem:[%s1128_s3 + $0x18] sm:$0xff]  }
  0xe6   :  { %v292_v12 = vpop.f32.mrf.mxu0  ;;  %v342_v56 = vsel %vm310_vm10, %v266_v33, %v326_v41  ;;  %v323_v59 = vmul.f32 0.22916667, %v253_v49  ;;  %vm307_vm13 = vcmp.ge.f32.partialorder %v253_v49, 0.0  ;;  %v354_v0 = vpack.c.bf16 %v341_v60, %v340_v63 }
  0xe7   :  { %v335_v14 = vmul.f32 0.22916667, %v301_v9  ;;  %v293_v15 = vadd.f32 %v292_v12, %v130_v54  ;;  %vm319_vm2 = vcmp.ge.f32.partialorder %v301_v9, 0.0  ;;  %v348_v25 = vsel %vm316_vm3, %v290_v5, %v332_v13  ;;  %v873_v12 = vld [vmem:[%s1128_s3 + $0x38] sm:$0xff]   ;;  %v460_v23 = vpop.permute.xlu1 %459 }
  0xe8   :  { %v250_v54 = vadd.f32 %v1057_v46, %v75_v44  ;;  %v355_v58 = vpack.c.bf16 %v343_v52, %v342_v56  ;;  %v321_v46 = vmul.f32 0.22916667, %v245_v53  ;;  %v339_v1 = vsel %vm307_vm13, %v253_v49, %v323_v59 }
  0xe9   :  { %vm317_vm4 = vcmp.ge.f32.partialorder %v293_v15, 0.0  ;;  %v333_v19 = vmul.f32 0.22916667, %v293_v15  ;;  %v351_v21 = vsel %vm319_vm2, %v301_v9, %v335_v14  ;;  %v320_v2 = vmul.f32 0.22916667, %v242_v62  ;;  %v870_v9 = vld [vmem:[%s1128_s3 + $0x20] sm:$0xff]  }
  0xea   :  { %v359_v22 = vpack.c.bf16 %v351_v21, %v350_v20  ;;  %v322_v48 = vmul.f32 0.22916667, %v250_v54  ;;  %vm306_vm14 = vcmp.ge.f32.partialorder %v250_v54, 0.0  ;;  %v337_v4 = vsel %vm305_vm15, %v245_v53, %v321_v46  ;;  %v465_v20 = vpop.permute.xlu0 %464 }
  0xeb   :  { %v349_v26 = vsel %vm317_vm4, %v293_v15, %v333_v19  ;;  %v336_v5 = vsel %vm304_vm0, %v242_v62, %v320_v2  ;;  %v875_v13 = vmov 0.0   ;;  %vm876_vm1 = vmmov 0  }
  0xec   :  { %801 = vmatprep.subr.bf16.mxu1 %v359_v22  ;;  %v358_v28 = vpack.c.bf16 %v349_v26, %v348_v25  ;;  %v338_v3 = vsel %vm306_vm14, %v250_v54, %v322_v48  ;;  %v352_v6 = vpack.c.bf16 %v337_v4, %v336_v5  ;;  %833 = vmatprep.subr.bf16.mxu0 %v875_v13 }
  0xed   :  { %802 = vmatpush3.bf16.msra.mxu1 %v359_v22  ;;  %v353_v50 = vpack.c.bf16 %v339_v1, %v338_v3  ;;  %849 = vmatprep.mubr.msk.bf16.mxu0 %vm876_vm1, %v875_v13 }
  0xee   :  { %803 = vmatprep.subr.bf16.mxu1 %v358_v28  ;;  %v455_v25 = vpop.permute.xlu0 %454 }
  0xf1   :  { %804 = vmatpush3.bf16.msra.mxu1 %v358_v28  ;;  %v450_v28 = vpop.permute.xlu1 %449 }
  0xf2   :  { %805 = vmatprep.subr.bf16.mxu1 %v357_v36  ;;  %v445_v30 = vpop.permute.xlu0 %444 }
  0xf5   :  { %806 = vmatpush3.bf16.msra.mxu1 %v357_v36  ;;  %v440_v34 = vpop.permute.xlu1 %439 }
  0xf6   :  { %807 = vmatprep.subr.bf16.mxu1 %v356_v45  ;;  %v435_v36 = vpop.permute.xlu0 %434 }
  0xf9   :  { %808 = vmatpush3.bf16.msra.mxu1 %v356_v45  ;;  %v430_v45 = vpop.permute.xlu1 %429 }
  0xfa   :  { %809 = vmatprep.subr.bf16.mxu1 %v355_v58  ;;  %v425_v56 = vpop.permute.xlu0 %424 }
  0xfd   :  { %810 = vmatpush3.bf16.msra.mxu1 %v355_v58  ;;  %v420_v62 = vpop.permute.xlu1 %419 }
  0xfe   :  { %811 = vmatprep.subr.bf16.mxu1 %v354_v0  ;;  %v415_v2 = vpop.permute.xlu0 %414 }
 0x101   :  { %812 = vmatpush3.bf16.msra.mxu1 %v354_v0 }
 0x102   :  { %813 = vmatprep.subr.bf16.mxu1 %v353_v50 }
 0x105   :  { %814 = vmatpush3.bf16.msra.mxu1 %v353_v50 }
 0x106   :  { %815 = vmatprep.subr.bf16.mxu1 %v352_v6 }
 0x109   :  { %816 = vmatpush3.bf16.msra.mxu1 %v352_v6 }
 0x10c   :  { %818 = vmatmul.mubr.bf16.vlgmr.msra.gmra.mxu1 %v867_v47 }
 0x10d   :  { %821 = vmatprep.mubr.bf16.mxu1 %v868_v7 }
 0x114   :  { %822 = vmatmul.mubr.bf16.gmra.mxu1 %v869_v8  ;;  %v410_v8 = vpop.permute.xlu1 %409 }
 0x115   :  { %825 = vmatprep.mubr.bf16.mxu1 %v870_v9 }
 0x11c   :  { %826 = vmatmul.mubr.bf16.gmra.mxu1 %v871_v10 }
 0x11d   :  { %829 = vmatprep.mubr.bf16.mxu1 %v872_v11 }
 0x124   :  { %830 = vmatmul.mubr.bf16.gmra.mxu1 %v873_v12  ;;  %v405_v12 = vpop.permute.xlu0 %404 }
 0x1cc   :  { %v1095_v14 = vpop.f32.mrf.mxu1 }
 0x1ce   :  { %v1097_v15 = vpop.f32.mrf.mxu1 }
 0x1d0   :  { %v1099_v16 = vpop.f32.mrf.mxu1 }
 0x1d2   :  { %v1101_v17 = vpop.f32.mrf.mxu1 }
 0x1d4   :  { %v823_v19 = vpop.f32.mrf.mxu1 }
 0x1d5   :  { %v579_v3 = vadd.f32 %v823_v19, %v425_v56  ;;  %v566_v19 = vadd.f32 %v1099_v16, %v410_v8 }
 0x1d6   :  { %v1103_v21 = vpop.f32.mrf.mxu1 }
 0x1d7   :  { %v639_v9 = vmul.f32 0.22916667, %v579_v3  ;;  %v571_v10 = vadd.f32 %v1103_v21, %v415_v2  ;;  %vm623_vm11 = vcmp.ge.f32.partialorder %v579_v3, 0.0  ;;  %vm620_vm14 = vcmp.ge.f32.partialorder %v566_v19, 0.0 }
 0x1d8   :  { %v824_v22 = vpop.f32.mrf.mxu1 }
 0x1d9   :  { %v582_v0 = vadd.f32 %v824_v22, %v430_v45  ;;  %vm621_vm13 = vcmp.ge.f32.partialorder %v571_v10, 0.0 }
 0x1da   :  { %v573_v24 = vpop.f32.mrf.mxu1 }
 0x1db   :  { %v640_v6 = vmul.f32 0.22916667, %v582_v0  ;;  %v574_v47 = vadd.f32 %v573_v24, %v420_v62  ;;  %vm624_vm10 = vcmp.ge.f32.partialorder %v582_v0, 0.0  ;;  %v655_v24 = vsel %vm623_vm11, %v579_v3, %v639_v9 }
 0x1dc   :  { %v827_v26 = vpop.f32.mrf.mxu1 }
 0x1dd   :  { %v595_v49 = vadd.f32 %v827_v26, %v445_v30  ;;  %v638_v22 = vmul.f32 0.22916667, %v574_v47  ;;  %vm622_vm12 = vcmp.ge.f32.partialorder %v574_v47, 0.0  ;;  %v400_v26 = vpop.permute.xlu1 %399  ;;  %v395_v30 = vpop.permute.xlu0 %394 }
 0x1de   :  { %v586_v27 = vpop.f32.mrf.mxu1 }
 0x1df   :  { %v643_v60 = vmul.f32 0.22916667, %v595_v49  ;;  %v587_v61 = vadd.f32 %v586_v27, %v435_v36  ;;  %vm627_vm7 = vcmp.ge.f32.partialorder %v595_v49, 0.0  ;;  %v636_v27 = vmul.f32 0.22916667, %v566_v19 }
 0x1e0   :  { %v828_v29 = vpop.f32.mrf.mxu1 }
 0x1e1   :  { %v598_v42 = vadd.f32 %v828_v29, %v450_v28  ;;  %v659_v50 = vsel %vm627_vm7, %v595_v49, %v643_v60  ;;  %v641_v4 = vmul.f32 0.22916667, %v587_v61  ;;  %vm625_vm9 = vcmp.ge.f32.partialorder %v587_v61, 0.0 }
 0x1e2   :  { %v589_v31 = vpop.f32.mrf.mxu1  ;;  %v558_v28 = vadd.f32 %v1101_v17, %v400_v26  ;;  %v654_v29 = vsel %vm622_vm12, %v574_v47, %v638_v22 }
 0x1e3   :  { %v644_v58 = vmul.f32 0.22916667, %v598_v42  ;;  %v590_v59 = vadd.f32 %v589_v31, %v440_v34  ;;  %vm628_vm6 = vcmp.ge.f32.partialorder %v598_v42, 0.0  ;;  %v657_v11 = vsel %vm625_vm9, %v587_v61, %v641_v4 }
 0x1e4   :  { %v831_v32 = vpop.f32.mrf.mxu1  ;;  %v555_v31 = vadd.f32 %v1097_v15, %v395_v30  ;;  %v634_v34 = vmul.f32 0.22916667, %v558_v28  ;;  %vm618_vm0 = vcmp.ge.f32.partialorder %v558_v28, 0.0 }
 0x1e5   :  { %v611_v33 = vadd.f32 %v831_v32, %v465_v20  ;;  %v660_v46 = vsel %vm628_vm6, %v598_v42, %v644_v58  ;;  %v642_v1 = vmul.f32 0.22916667, %v590_v59  ;;  %vm626_vm8 = vcmp.ge.f32.partialorder %v590_v59, 0.0 }
 0x1e6   :  { %v602_v35 = vpop.f32.mrf.mxu1  ;;  %v670_v5 = vpack.c.bf16 %v660_v46, %v659_v50  ;;  %v656_v20 = vsel %vm624_vm10, %v582_v0, %v640_v6  ;;  %v633_v36 = vmul.f32 0.22916667, %v555_v31  ;;  %vm617_vm1 = vcmp.ge.f32.partialorder %v555_v31, 0.0 }
 0x1e7   :  { %v647_v37 = vmul.f32 0.22916667, %v611_v33  ;;  %vm631_vm2 = vcmp.ge.f32.partialorder %v611_v33, 0.0  ;;  %v603_v39 = vadd.f32 %v602_v35, %v455_v25  ;;  %v658_v7 = vsel %vm626_vm8, %v590_v59, %v642_v1 }
 0x1e8   :  { %v832_v38 = vpop.f32.mrf.mxu1  ;;  %v637_v25 = vmul.f32 0.22916667, %v571_v10  ;;  %v668_v21 = vpack.c.bf16 %v656_v20, %v655_v24 }
 0x1e9   :  { %v614_v40 = vadd.f32 %v832_v38, %v470_v18  ;;  %v663_v51 = vsel %vm631_vm2, %v611_v33, %v647_v37  ;;  %v645_v52 = vmul.f32 0.22916667, %v603_v39  ;;  %vm629_vm5 = vcmp.ge.f32.partialorder %v603_v39, 0.0 }
 0x1ea   :  { %v605_v41 = vpop.f32.mrf.mxu1  ;;  %v669_v18 = vpack.c.bf16 %v658_v7, %v657_v11  ;;  %v653_v32 = vsel %vm621_vm13, %v571_v10, %v637_v25  ;;  %v652_v33 = vsel %vm620_vm14, %v566_v19, %v636_v27  ;;  %v650_v37 = vsel %vm618_vm0, %v558_v28, %v634_v34 }
 0x1eb   :  { %vm632_vm3 = vcmp.ge.f32.partialorder %v614_v40, 0.0  ;;  %v648_v43 = vmul.f32 0.22916667, %v614_v40  ;;  %v606_v44 = vadd.f32 %v605_v41, %v460_v23  ;;  %v661_v48 = vsel %vm629_vm5, %v603_v39, %v645_v52  ;;  %v673_v39 = vld [vmem:[%s1129_s5] sm:$0xf] }
 0x1ec   :  { %v563_v23 = vadd.f32 %v1095_v14, %v405_v12  ;;  %v667_v14 = vpack.c.bf16 %v654_v29, %v653_v32  ;;  %v649_v38 = vsel %vm617_vm1, %v555_v31, %v633_v36 }
 0x1ed   :  { %v664_v54 = vsel %vm632_vm3, %v614_v40, %v648_v43  ;;  %vm630_vm4 = vcmp.ge.f32.partialorder %v606_v44, 0.0  ;;  %v646_v55 = vmul.f32 0.22916667, %v606_v44  ;;  %v665_v15 = vpack.c.bf16 %v650_v37, %v649_v38  ;;  %v678_v40 = vpop.permute.xlu0 %677 }
 0x1ee   :  { %v672_v57 = vpack.c.bf16 %v664_v54, %v663_v51  ;;  %v635_v16 = vmul.f32 0.22916667, %v563_v23  ;;  %vm619_vm15 = vcmp.ge.f32.partialorder %v563_v23, 0.0 }
 0x1ef   :  { %v662_v53 = vsel %vm630_vm4, %v606_v44, %v646_v55 }
 0x1f0   :  { %834 = vmatpush3.bf16.msra.mxu0 %v672_v57  ;;  %v671_v63 = vpack.c.bf16 %v662_v53, %v661_v48  ;;  %v651_v35 = vsel %vm619_vm15, %v563_v23, %v635_v16 }
 0x1f1   :  { %835 = vmatprep.subr.bf16.mxu0 %v875_v13  ;;  %v666_v17 = vpack.c.bf16 %v652_v33, %v651_v35 }
 0x1f4   :  { %836 = vmatpush3.bf16.msra.mxu0 %v671_v63 }
 0x1f5   :  { %837 = vmatprep.subr.bf16.mxu0 %v875_v13 }
 0x1f8   :  { %838 = vmatpush3.bf16.msra.mxu0 %v670_v5 }
 0x1f9   :  { %839 = vmatprep.subr.bf16.mxu0 %v875_v13 }
 0x1fc   :  { %840 = vmatpush3.bf16.msra.mxu0 %v669_v18 }
 0x1fd   :  { %841 = vmatprep.subr.bf16.mxu0 %v875_v13 }
 0x200   :  { %842 = vmatpush3.bf16.msra.mxu0 %v668_v21 }
 0x201   :  { %843 = vmatprep.subr.bf16.mxu0 %v875_v13 }
 0x204   :  { %844 = vmatpush3.bf16.msra.mxu0 %v667_v14 }
 0x205   :  { %845 = vmatprep.subr.bf16.mxu0 %v875_v13 }
 0x208   :  { %846 = vmatpush3.bf16.msra.mxu0 %v666_v17 }
 0x209   :  { %847 = vmatprep.subr.bf16.mxu0 %v875_v13 }
 0x20c   :  { %848 = vmatpush3.bf16.msra.mxu0 %v665_v15 }
 0x20f   :  { %850 = vmatmul.mubr.bf16.vlgmr.msra.gmra.mxu0 %v673_v39 }
 0x2cf   :  { %v714_v41 = vpop.f32.mrf.mxu0 }
 0x2d0   :  { %v715_v42 = vadd.f32 %v714_v41, %v678_v40 }
 0x2d1   :  { %v851_v43 = vpop.f32.mrf.mxu0 }
 0x2d2   :  { %720 = vst [vmem:[%s1130_s7] sm:$0xff] %v715_v42 }
 0x2d3   :  { %v717_v44 = vpop.f32.mrf.mxu0 }
 0x2d5   :  { %v852_v45 = vpop.f32.mrf.mxu0 }

</bundles_post_ra>
